<compile_context>
chip_gen: v7x
topology: tpu7x:2x2x1
jax: 0.10.0
libtpu: 0.0.40
codegen_flags: <defaults>
</compile_context>

<pallas_src>
import functools

import jax
import jax.numpy as jnp
from jax.experimental import pallas as pl
from jax.experimental.pallas import tpu as pltpu

_LANE = 128      # vreg lane width
_SUBLANE = 8     # vreg sublane width (f32)


def _round_up(x, m):
    return ((x + m - 1) // m) * m


def _hidden_act(h, nonlinearity):
    """Hidden-layer nonlinearity (static Python branch, resolved at trace)."""
    if nonlinearity == "relu":
        return jnp.maximum(h, 0.0)                                  # VPU
    elif nonlinearity == "elu":
        # exp only evaluated on the clamped value -> no overflow in the
        # unselected branch; exp goes to the EUP (free slot vs VALU).
        return jnp.where(h > 0.0, h, jnp.exp(jnp.minimum(h, 0.0)) - 1.0)
    else:  # 'tanh'
        return jnp.tanh(h)                                          # EUP


def _actor_kernel(x_ref, w1_ref, b1_ref, w2_ref, b2_ref, w3_ref, b3_ref,
                  a_ref, a1_ref, *, max_action, nonlinearity):
    """Fused 3-layer MLP on one batch tile: act -> act -> max_action*tanh."""
    x = x_ref[...]

    h1 = jnp.dot(x, w1_ref[...], preferred_element_type=jnp.float32) + b1_ref[...]
    h1 = _hidden_act(h1, nonlinearity)

    h2 = jnp.dot(h1, w2_ref[...], preferred_element_type=jnp.float32) + b2_ref[...]
    h2 = _hidden_act(h2, nonlinearity)
    a1_ref[...] = h2.astype(a1_ref.dtype)                           # lane-dense store

    z = jnp.dot(h2, w3_ref[...], preferred_element_type=jnp.float32) + b3_ref[...]
    a_ref[...] = (max_action * jnp.tanh(z)).astype(a_ref.dtype)     # tanh on EUP


def actor_forward(state, params, max_action, *, nonlinearity="relu",
                  batch_tile=512):
    """Fused Pallas forward. Returns (a, a1) like the PyTorch module."""
    w1, b1, w2, b2, w3, b3 = params
    B, S = state.shape
    H = w1.shape[1]
    A = w3.shape[1]

    # ---- pad feature dims to the 128-lane width (zero padding, math-neutral) ----
    Sp = _round_up(S, _LANE)
    Hp = _round_up(H, _LANE)
    Ap = _round_up(A, _LANE)

    # ---- batch tile: multiple of 8 sublanes; amortizes per-grid-step overhead ----
    TB = max(_SUBLANE, min(batch_tile, _round_up(B, _SUBLANE)))
    TB = _round_up(TB, _SUBLANE)
    Bp = _round_up(B, TB)
    grid_b = Bp // TB

    f32 = jnp.float32
    pad2 = lambda x, r, c: jnp.pad(
        x.astype(f32), ((0, r - x.shape[0]), (0, c - x.shape[1])))

    state_p = pad2(state, Bp, Sp)
    w1p, b1p = pad2(w1, Sp, Hp), pad2(b1, 1, Hp)
    w2p, b2p = pad2(w2, Hp, Hp), pad2(b2, 1, Hp)
    w3p, b3p = pad2(w3, Hp, Ap), pad2(b3, 1, Ap)

    kernel = functools.partial(_actor_kernel, max_action=float(max_action),
                               nonlinearity=nonlinearity)

    # Streaming tiles follow the batch grid; weights/biases are grid-constant
    # (index_map always (0, 0)) so they stay VMEM-resident across the grid.
    tile_state = pl.BlockSpec((TB, Sp), lambda i: (i, 0))
    const = lambda shp: pl.BlockSpec(shp, lambda i: (0, 0))

    # Advisory cost for the XLA scheduler around the custom call.
    flops = 2 * Bp * (Sp * Hp + Hp * Hp + Hp * Ap)
    bytes_accessed = 4 * (Bp * Sp                      # state in
                          + Sp * Hp + Hp               # l1
                          + Hp * Hp + Hp               # l2
                          + Hp * Ap + Ap               # l3
                          + Bp * Ap + Bp * Hp)         # a, a1 out
    cost = pl.CostEstimate(flops=flops, transcendentals=Bp * (Ap + 2 * Hp),
                           bytes_accessed=bytes_accessed)

    # VMEM budget: double-buffered streaming tiles + resident weights + live
    # intermediates, with 2x slack; capped at 32 MiB (safe on v5e/v6e/v7x).
    vmem_bytes = 4 * (2 * TB * (Sp + Hp + Ap)                            # stream bufs
                      + 2 * (Sp * Hp + Hp * Hp + Hp * Ap + 2 * Hp + Ap)  # weights
                      + 2 * TB * Hp)                                     # h1 / h2
    vmem_limit = int(min(max(2 * vmem_bytes, 4 << 20), 32 << 20))

    a_p, a1_p = pl.pallas_call(
        kernel,
        out_shape=(
            jax.ShapeDtypeStruct((Bp, Ap), f32),
            jax.ShapeDtypeStruct((Bp, Hp), f32),
        ),
        grid=(grid_b,),
        in_specs=[
            tile_state,
            const((Sp, Hp)), const((1, Hp)),
            const((Hp, Hp)), const((1, Hp)),
            const((Hp, Ap)), const((1, Ap)),
        ],
        out_specs=(
            pl.BlockSpec((TB, Ap), lambda i: (i, 0)),
            pl.BlockSpec((TB, Hp), lambda i: (i, 0)),
        ),
        compiler_params=pltpu.CompilerParams(
            dimension_semantics=("parallel",),
            vmem_limit_bytes=vmem_limit,
        ),
        cost_estimate=cost,
    )(state_p, w1p, b1p, w2p, b2p, w3p, b3p)

    # Slice away feature / batch padding (padded weight columns are exactly
    # zero, so nothing leaks into the retained columns).
    return a_p[:B, :A], a1_p[:B, :H]


def init_actor_params(key, state_dim, hidden, action_dim,
                      eps1=20.0, eps2=20.0):
    """Deterministic init mimicking nn.Linear defaults + ER sparsity masks on
    l1 / l2 weights (mask applied once at init, as in the PyTorch module)."""
    ks = jax.random.split(key, 8)

    def linear(kw, kb, fan_in, fan_out):
        bound = 1.0 / jnp.sqrt(fan_in)
        # stored as [in, out] (transposed vs PyTorch's [out, in])
        w = jax.random.uniform(kw, (fan_in, fan_out), jnp.float32, -bound, bound)
        b = jax.random.uniform(kb, (1, fan_out), jnp.float32, -bound, bound)
        return w, b

    w1, b1 = linear(ks[0], ks[1], state_dim, hidden)
    w2, b2 = linear(ks[2], ks[3], hidden, hidden)
    w3, b3 = linear(ks[4], ks[5], hidden, action_dim)

    # Erdos-Renyi sparsity mask stand-in for sp.initializeEpsilonWeightsMask:
    # keep-probability eps*(fan_in+fan_out)/(fan_in*fan_out), clipped to 1.
    # TODO(synk): match the exact sp.initializeEpsilonWeightsMask formula/eps
    # from the original codebase if a specific sparsity level is required.
    def er_mask(k, fan_in, fan_out, eps):
        p = jnp.minimum(eps * (fan_in + fan_out) / (fan_in * fan_out), 1.0)
        return jax.random.bernoulli(k, p, (fan_in, fan_out)).astype(jnp.float32)

    w1 = w1 * er_mask(ks[6], state_dim, hidden, eps1)
    w2 = w2 * er_mask(ks[7], hidden, hidden, eps2)

    return (w1, b1, w2, b2, w3, b3)


def _reference_forward(state, params, max_action, nonlinearity):
    """Plain-JAX reference matching the PyTorch forward."""
    w1, b1, w2, b2, w3, b3 = params
    if nonlinearity == "relu":
        act = lambda x: jnp.maximum(x, 0.0)
    elif nonlinearity == "elu":
        act = lambda x: jnp.where(x > 0.0, x, jnp.exp(jnp.minimum(x, 0.0)) - 1.0)
    else:
        act = jnp.tanh
    h1 = act(state @ w1 + b1)
    h2 = act(h1 @ w2 + b2)
    a = max_action * jnp.tanh(h2 @ w3 + b3)
    return a, h2


if __name__ == "__main__":
    # Small shapes consistent with the module's forward.
    batch = 8
    state_dim = 16
    hidden = 32        # noHidNeurons
    action_dim = 8
    max_action = 2.0

    key = jax.random.PRNGKey(0)
    k_params, k_state = jax.random.split(key)

    params = init_actor_params(k_params, state_dim, hidden, action_dim)
    state = jax.random.normal(k_state, (batch, state_dim), jnp.float32)

    ok = True
    for nl in ("relu", "elu", "tanh"):
        a, a1 = actor_forward(state, params, max_action, nonlinearity=nl)
        jax.block_until_ready((a, a1))

        a_ref, a1_ref = _reference_forward(state, params, max_action, nl)
        ok &= a.shape == (batch, action_dim) and a1.shape == (batch, hidden)
        ok &= bool(jnp.allclose(a, a_ref, atol=1e-5))
        ok &= bool(jnp.allclose(a1, a1_ref, atol=1e-5))

    assert ok, "kernel output mismatch vs reference"
    print("KERNEL_OK")
</pallas_src>

<mosaic_0001>
module attributes {stable_mosaic.version = 11 : i64} {
  func.func @_actor_kernel(%arg0: i32, %arg1: memref<8x128xf32, #tpu.memory_space<vmem>>, %arg2: memref<128x128xf32, #tpu.memory_space<vmem>>, %arg3: memref<1x128xf32, #tpu.memory_space<vmem>>, %arg4: memref<128x128xf32, #tpu.memory_space<vmem>>, %arg5: memref<1x128xf32, #tpu.memory_space<vmem>>, %arg6: memref<128x128xf32, #tpu.memory_space<vmem>>, %arg7: memref<1x128xf32, #tpu.memory_space<vmem>>, %arg8: memref<8x128xf32, #tpu.memory_space<vmem>>, %arg9: memref<8x128xf32, #tpu.memory_space<vmem>>) attributes {dimension_semantics = [#tpu.dimension_semantics<parallel>], iteration_bounds = array<i64: 1>, scalar_prefetch = 0 : i64, scratch_operands = 0 : i64, tpu.core_type = #tpu.core_type<tc>, window_params = [{transform_indices = @transform_0, window_bounds = array<i64: 8, 128>}, {pipeline_mode = #tpu.pipeline_mode<synchronous>, transform_indices = @transform_1, window_bounds = array<i64: 128, 128>}, {pipeline_mode = #tpu.pipeline_mode<synchronous>, transform_indices = @transform_2, window_bounds = array<i64: 1, 128>}, {pipeline_mode = #tpu.pipeline_mode<synchronous>, transform_indices = @transform_3, window_bounds = array<i64: 128, 128>}, {pipeline_mode = #tpu.pipeline_mode<synchronous>, transform_indices = @transform_4, window_bounds = array<i64: 1, 128>}, {pipeline_mode = #tpu.pipeline_mode<synchronous>, transform_indices = @transform_5, window_bounds = array<i64: 128, 128>}, {pipeline_mode = #tpu.pipeline_mode<synchronous>, transform_indices = @transform_6, window_bounds = array<i64: 1, 128>}, {transform_indices = @transform_7, window_bounds = array<i64: 8, 128>}, {transform_indices = @transform_8, window_bounds = array<i64: 8, 128>}]} {
    %c0 = arith.constant 0 : index
    %c0_0 = arith.constant 0 : index
    %0 = vector.load %arg1[%c0, %c0_0] : memref<8x128xf32, #tpu.memory_space<vmem>>, vector<8x128xf32>
    %c0_1 = arith.constant 0 : index
    %c0_2 = arith.constant 0 : index
    %1 = vector.load %arg2[%c0_1, %c0_2] : memref<128x128xf32, #tpu.memory_space<vmem>>, vector<128x128xf32>
    %cst = arith.constant dense<0.000000e+00> : vector<8x128xf32>
    %2 = tpu.matmul %0, %1, %cst {dimension_numbers = #tpu.dot_dimension_numbers<[1], [0], [0], [1], [0, 0, 1, 1], [], []>} : vector<8x128xf32>, vector<128x128xf32>, vector<8x128xf32> -> vector<8x128xf32>
    %c0_3 = arith.constant 0 : index
    %c0_4 = arith.constant 0 : index
    %3 = vector.load %arg3[%c0_3, %c0_4] : memref<1x128xf32, #tpu.memory_space<vmem>>, vector<1x128xf32>
    %4 = vector.broadcast %3 : vector<1x128xf32> to vector<8x128xf32>
    %5 = arith.addf %2, %4 : vector<8x128xf32>
    %cst_5 = arith.constant 0.000000e+00 : f32
    %6 = vector.broadcast %cst_5 : f32 to vector<8x128xf32>
    %7 = arith.maximumf %5, %6 : vector<8x128xf32>
    %c0_6 = arith.constant 0 : index
    %c0_7 = arith.constant 0 : index
    %8 = vector.load %arg4[%c0_6, %c0_7] : memref<128x128xf32, #tpu.memory_space<vmem>>, vector<128x128xf32>
    %cst_8 = arith.constant dense<0.000000e+00> : vector<8x128xf32>
    %9 = tpu.matmul %7, %8, %cst_8 {dimension_numbers = #tpu.dot_dimension_numbers<[1], [0], [0], [1], [0, 0, 1, 1], [], []>} : vector<8x128xf32>, vector<128x128xf32>, vector<8x128xf32> -> vector<8x128xf32>
    %c0_9 = arith.constant 0 : index
    %c0_10 = arith.constant 0 : index
    %10 = vector.load %arg5[%c0_9, %c0_10] : memref<1x128xf32, #tpu.memory_space<vmem>>, vector<1x128xf32>
    %11 = vector.broadcast %10 : vector<1x128xf32> to vector<8x128xf32>
    %12 = arith.addf %9, %11 : vector<8x128xf32>
    %cst_11 = arith.constant 0.000000e+00 : f32
    %13 = vector.broadcast %cst_11 : f32 to vector<8x128xf32>
    %14 = arith.maximumf %12, %13 : vector<8x128xf32>
    %c0_12 = arith.constant 0 : index
    %c0_13 = arith.constant 0 : index
    %15 = vector.load %arg9[%c0_12, %c0_13] : memref<8x128xf32, #tpu.memory_space<vmem>>, vector<8x128xf32>
    tpu.vector_store %arg9[%c0_12, %c0_13], %14 {strides = array<i32>} : memref<8x128xf32, #tpu.memory_space<vmem>>, vector<8x128xf32>,
    %c0_14 = arith.constant 0 : index
    %c0_15 = arith.constant 0 : index
    %16 = vector.load %arg6[%c0_14, %c0_15] : memref<128x128xf32, #tpu.memory_space<vmem>>, vector<128x128xf32>
    %cst_16 = arith.constant dense<0.000000e+00> : vector<8x128xf32>
    %17 = tpu.matmul %14, %16, %cst_16 {dimension_numbers = #tpu.dot_dimension_numbers<[1], [0], [0], [1], [0, 0, 1, 1], [], []>} : vector<8x128xf32>, vector<128x128xf32>, vector<8x128xf32> -> vector<8x128xf32>
    %c0_17 = arith.constant 0 : index
    %c0_18 = arith.constant 0 : index
    %18 = vector.load %arg7[%c0_17, %c0_18] : memref<1x128xf32, #tpu.memory_space<vmem>>, vector<1x128xf32>
    %19 = vector.broadcast %18 : vector<1x128xf32> to vector<8x128xf32>
    %20 = arith.addf %17, %19 : vector<8x128xf32>
    %21 = math.tanh %20 : vector<8x128xf32>
    %cst_19 = arith.constant 2.000000e+00 : f32
    %22 = vector.broadcast %cst_19 : f32 to vector<8x128xf32>
    %23 = arith.mulf %22, %21 : vector<8x128xf32>
    %c0_20 = arith.constant 0 : index
    %c0_21 = arith.constant 0 : index
    %24 = vector.load %arg8[%c0_20, %c0_21] : memref<8x128xf32, #tpu.memory_space<vmem>>, vector<8x128xf32>
    tpu.vector_store %arg8[%c0_20, %c0_21], %23 {strides = array<i32>} : memref<8x128xf32, #tpu.memory_space<vmem>>, vector<8x128xf32>,
    return
  }
  func.func @transform_0(%arg0: i32) -> (i32, i32) {
    %c0_i32 = arith.constant 0 : i32
    %c0_i32_0 = arith.constant 0 : i32
    return %arg0, %c0_i32 : i32, i32
  }
  func.func @transform_1(%arg0: i32) -> (i32, i32) {
    %c0_i32 = arith.constant 0 : i32
    %c0_i32_0 = arith.constant 0 : i32
    %c0_i32_1 = arith.constant 0 : i32
    return %c0_i32, %c0_i32_0 : i32, i32
  }
  func.func @transform_2(%arg0: i32) -> (i32, i32) {
    %c0_i32 = arith.constant 0 : i32
    %c0_i32_0 = arith.constant 0 : i32
    %c0_i32_1 = arith.constant 0 : i32
    return %c0_i32, %c0_i32_0 : i32, i32
  }
  func.func @transform_3(%arg0: i32) -> (i32, i32) {
    %c0_i32 = arith.constant 0 : i32
    %c0_i32_0 = arith.constant 0 : i32
    %c0_i32_1 = arith.constant 0 : i32
    return %c0_i32, %c0_i32_0 : i32, i32
  }
  func.func @transform_4(%arg0: i32) -> (i32, i32) {
    %c0_i32 = arith.constant 0 : i32
    %c0_i32_0 = arith.constant 0 : i32
    %c0_i32_1 = arith.constant 0 : i32
    return %c0_i32, %c0_i32_0 : i32, i32
  }
  func.func @transform_5(%arg0: i32) -> (i32, i32) {
    %c0_i32 = arith.constant 0 : i32
    %c0_i32_0 = arith.constant 0 : i32
    %c0_i32_1 = arith.constant 0 : i32
    return %c0_i32, %c0_i32_0 : i32, i32
  }
  func.func @transform_6(%arg0: i32) -> (i32, i32) {
    %c0_i32 = arith.constant 0 : i32
    %c0_i32_0 = arith.constant 0 : i32
    %c0_i32_1 = arith.constant 0 : i32
    return %c0_i32, %c0_i32_0 : i32, i32
  }
  func.func @transform_7(%arg0: i32) -> (i32, i32) {
    %c0_i32 = arith.constant 0 : i32
    %c0_i32_0 = arith.constant 0 : i32
    return %arg0, %c0_i32 : i32, i32
  }
  func.func @transform_8(%arg0: i32) -> (i32, i32) {
    %c0_i32 = arith.constant 0 : i32
    %c0_i32_0 = arith.constant 0 : i32
    return %arg0, %c0_i32 : i32, i32
  }
}

</mosaic_0001>

<bundles_post_ra>
// kernel: tpu_custom_call.1
= control target key start
LH: loop header
LB: loop body
LE: loop exit
PB: predicated region body
PF: predicated region fallthrough
CT: control target
= control target key end

     0   :  { %14 = vsyncpa [#allocation3], 0  ;;  %s962_s0 = inlined_call_operand.hbm [shape: f32[8,128], index: 0, kind: input, shape index: {}]   ;;  %s963_s1 = inlined_call_operand.hbm [shape: f32[128,128], index: 1, kind: input, shape index: {}]   ;;  %s964_s2 = inlined_call_operand.vmem [shape: f32[1,128], index: 2, kind: input, shape index: {}]   ;;  %s965_s3 = inlined_call_operand.hbm [shape: f32[128,128], index: 3, kind: input, shape index: {}]   ;;  %s966_s4 = inlined_call_operand.vmem [shape: f32[1,128], index: 4, kind: input, shape index: {}]   ;;  %s967_s5 = inlined_call_operand.hbm [shape: f32[128,128], index: 5, kind: input, shape index: {}]   ;;  %s968_s6 = inlined_call_operand.vmem [shape: f32[1,128], index: 6, kind: input, shape index: {}]   ;;  %s969_s7 = inlined_call_operand.hbm [shape: f32[8,128], index: 7, kind: output, shape index: {0}]   ;;  %s970_s8 = inlined_call_operand.hbm [shape: f32[8,128], index: 8, kind: output, shape index: {1}]  }
   0x1   :  { %15 = vsyncpa [#allocation6], 0 }
   0x2   :  { %16 = vsyncpa [#allocation9], 0 }
   0x3   :  { %17 = vsyncpa [#allocation4], 0 }
   0x4   :  { %18 = vsyncpa [#allocation12], 0  ;;  %s786_s27 = smov [#allocation5]   ;;  %s644_s9 = scalar_lea.hbm %s963_s1, 2048 }
   0x5   :  { %s34_s28 = sshll.u32 %s786_s27, 4  ;;  %p645_p0 = scmp.ne.s32.totalorder %s963_s1, %s644_s9  ;;  %s35_s28 = int_to_ptr.vmem [resolvable:$true] %s34_s28 }
   0x6   :  { %p648_p1 = scmp.lt.u32.totalorder %s644_s9, %s963_s1 }
   0x8   :  { %p650_p2 = pnand %p648_p1, %p645_p0 }
   0xa   :  { %653 = shalt.err (!%p650_p2)
}
   0xb   :  { %s654_s14 = scalar_lea.vmem %s35_s28, 2048  ;;  %p659_p4 = scmp.lt.s32.totalorder %s35_s28, %s35_s28 }
   0xc   :  { %p655_p3 = scmp.ne.s32.totalorder %s35_s28, %s654_s14  ;;  %p660_p5 = scmp.lt.s32.totalorder %s654_s14, %s654_s14 }
   0xe   :  { %p661_p6 = por %p660_p5, %p659_p4 }
  0x10   :  { %p662_p7 = pnand %p661_p6, %p655_p3 }
  0x12   :  { %665 = shalt.err (!%p662_p7)
}
  0x13   :  { %s787_s15 = smov 128   ;;  %s788_s16 = smov 8  }
  0x14   :  { %40 = dma.hbm_to_vmem [thread:$0]  %s963_s1, 2048, %s35_s28, [#allocation6], %s787_s15, %s787_s15, %s788_s16  }
  0x15   :  { %s789_s19 = smov [#allocation2]   ;;  %s790_s21 = smov [#allocation7]  }
  0x16   :  { %s25_s20 = sshll.u32 %s789_s19, 4  ;;  %s48_s22 = sshll.u32 %s790_s21, 4  ;;  %s26_s20 = int_to_ptr.vmem [resolvable:$true] %s25_s20  ;;  %s49_s22 = int_to_ptr.vmem [resolvable:$true] %s48_s22 }
  0x17   :  { %s666_s25 = scalar_lea.hbm %s962_s0, 128 }
  0x18   :  { %p667_p8 = scmp.ne.s32.totalorder %s962_s0, %s666_s25  ;;  %p670_p9 = scmp.lt.u32.totalorder %s666_s25, %s962_s0 }
  0x1a   :  { %p672_p10 = pnand %p670_p9, %p667_p8 }
  0x1c   :  { %675 = shalt.err (!%p672_p10)
}
  0x1d   :  { %s676_s1 = scalar_lea.vmem %s26_s20, 128  ;;  %p681_p12 = scmp.lt.s32.totalorder %s26_s20, %s26_s20 }
  0x1e   :  { %p677_p11 = scmp.ne.s32.totalorder %s26_s20, %s676_s1  ;;  %p682_p13 = scmp.lt.s32.totalorder %s676_s1, %s676_s1 }
  0x20   :  { %p683_p0 = por %p682_p13, %p681_p12 }
  0x22   :  { %p684_p1 = pnand %p683_p0, %p677_p11 }
  0x24   :  { %687 = shalt.err (!%p684_p1)
}
  0x25   :  { %28 = dma.hbm_to_vmem [thread:$0]  %s962_s0, 128, %s26_s20, [#allocation3]  }
  0x26   :  { %s688_s12 = scalar_lea.hbm %s965_s3, 2048 }
  0x27   :  { %p689_p2 = scmp.ne.s32.totalorder %s965_s3, %s688_s12  ;;  %p692_p3 = scmp.lt.u32.totalorder %s688_s12, %s965_s3 }
  0x29   :  { %p694_p4 = pnand %p692_p3, %p689_p2 }
  0x2b   :  { %697 = shalt.err (!%p694_p4)
}
  0x2c   :  { %s698_s19 = scalar_lea.vmem %s49_s22, 2048  ;;  %p703_p6 = scmp.lt.s32.totalorder %s49_s22, %s49_s22 }
  0x2d   :  { %p699_p5 = scmp.ne.s32.totalorder %s49_s22, %s698_s19  ;;  %p704_p7 = scmp.lt.s32.totalorder %s698_s19, %s698_s19 }
  0x2f   :  { %p705_p8 = por %p704_p7, %p703_p6 }
  0x31   :  { %p706_p9 = pnand %p705_p8, %p699_p5 }
  0x33   :  { %709 = shalt.err (!%p706_p9)
}
  0x34   :  { %54 = dma.hbm_to_vmem [thread:$0]  %s965_s3, 2048, %s49_s22, [#allocation6], %s787_s15, %s787_s15, %s788_s16  }
  0x35   :  { %s791_s21 = smov [#allocation8]   ;;  %s710_s26 = scalar_lea.hbm %s967_s5, 2048 }
  0x36   :  { %s62_s23 = sshll.u32 %s791_s21, 4  ;;  %p711_p10 = scmp.ne.s32.totalorder %s967_s5, %s710_s26  ;;  %s63_s23 = int_to_ptr.vmem [resolvable:$true] %s62_s23 }
  0x37   :  { %p714_p11 = scmp.lt.u32.totalorder %s710_s26, %s967_s5 }
  0x39   :  { %p716_p12 = pnand %p714_p11, %p711_p10 }
  0x3b   :  { %719 = shalt.err (!%p716_p12)
}
  0x3c   :  { %s720_s28 = scalar_lea.vmem %s63_s23, 2048  ;;  %p725_p0 = scmp.lt.s32.totalorder %s63_s23, %s63_s23 }
  0x3d   :  { %p721_p13 = scmp.ne.s32.totalorder %s63_s23, %s720_s28  ;;  %p726_p1 = scmp.lt.s32.totalorder %s720_s28, %s720_s28 }
  0x3f   :  { %p727_p2 = por %p726_p1, %p725_p0 }
  0x41   :  { %p728_p3 = pnand %p727_p2, %p721_p13 }
  0x43   :  { %731 = shalt.err (!%p728_p3)
}
  0x44   :  { %68 = dma.hbm_to_vmem [thread:$0]  %s967_s5, 2048, %s63_s23, [#allocation9], %s787_s15, %s787_s15, %s788_s16  }
  0x45   :  { %776 = dma.done.wait [#allocation3], 128  }
  0x46   :  { %777 = vsyncadd [#allocation3], 4294967168 }
  0x47   :  { %778 = dma.done.wait [#allocation6], 4096  }
  0x48   :  { %779 = vsyncadd [#allocation6], 4294963200 }
  0x49   :  { %780 = dma.done.wait [#allocation9], 2048  }
  0x4a   :  { %781 = vsyncadd [#allocation9], 4294965248  ;;  %v792_v0 = vmov 0.0|0.0   ;;  %vm793_vm0 = vmmov 0   ;;  %v794_v1 = vmov 0.0   ;;  %v84_v2 = vld [vmem:[#allocation5] sm:$0xff] }
  0x4b   :  { %559 = vmatprep.subr.bf16.mxu0 %v792_v0  ;;  %486 = vmatprep.mubr.msk.f32.mxu0 %vm793_vm0, %v794_v1  ;;  %v85_v3 = vld [vmem:[#allocation5 + $0x8] sm:$0xff]  ;;  %v86_v4 = vld [vmem:[#allocation5 + $0x10] sm:$0xff]  ;;  %v87_v6 = vld [vmem:[#allocation5 + $0x18] sm:$0xff] }
  0x4c   :  { %583 = vmatprep.subr.bf16.mxu1 %v792_v0  ;;  %521 = vmatprep.mubr.msk.f32.mxu1 %vm793_vm0, %v794_v1  ;;  %v560_v5 = vpack.c.bf16 %v85_v3, %v84_v2  ;;  %v563_v7 = vpack.c.bf16 %v87_v6, %v86_v4  ;;  %v88_v8 = vld [vmem:[#allocation5 + $0x20] sm:$0xff]  ;;  %v89_v9 = vld [vmem:[#allocation5 + $0x28] sm:$0xff]  ;;  %v180_v12 = vld [vmem:[#allocation7 + $0x10] sm:$0xff] }
  0x4d   :  { %v178_v10 = vld [vmem:[#allocation7] sm:$0xff]  ;;  %v179_v11 = vld [vmem:[#allocation7 + $0x8] sm:$0xff]  ;;  %v181_v13 = vld [vmem:[#allocation7 + $0x18] sm:$0xff]  ;;  %v566_v14 = vpack.c.bf16 %v89_v9, %v88_v8 }
  0x4e   :  { %561 = vmatpush3.bf16.msra.mxu0 %v560_v5  ;;  %v584_v15 = vpack.c.bf16 %v179_v11, %v178_v10  ;;  %v90_v16 = vld [vmem:[#allocation5 + $0x30] sm:$0xff]  ;;  %v91_v17 = vld [vmem:[#allocation5 + $0x38] sm:$0xff]  ;;  %v587_v18 = vpack.c.bf16 %v181_v13, %v180_v12  ;;  %v182_v19 = vld [vmem:[#allocation7 + $0x20] sm:$0xff] }
  0x4f   :  { %562 = vmatprep.subr.bf16.mxu0 %v792_v0  ;;  %v183_v20 = vld [vmem:[#allocation7 + $0x28] sm:$0xff]  ;;  %v569_v21 = vpack.c.bf16 %v91_v17, %v90_v16  ;;  %v92_v22 = vld [vmem:[#allocation5 + $0x40] sm:$0xff]  ;;  %v184_v25 = vld [vmem:[#allocation7 + $0x30] sm:$0xff] }
  0x50   :  { %585 = vmatpush3.bf16.msra.mxu1 %v584_v15  ;;  %v93_v23 = vld [vmem:[#allocation5 + $0x48] sm:$0xff]  ;;  %v590_v24 = vpack.c.bf16 %v183_v20, %v182_v19  ;;  %v185_v26 = vld [vmem:[#allocation7 + $0x38] sm:$0xff]  ;;  %v94_v28 = vld [vmem:[#allocation5 + $0x50] sm:$0xff] }
  0x51   :  { %586 = vmatprep.subr.bf16.mxu1 %v792_v0  ;;  %v572_v27 = vpack.c.bf16 %v93_v23, %v92_v22  ;;  %v95_v29 = vld [vmem:[#allocation5 + $0x58] sm:$0xff]  ;;  %v593_v30 = vpack.c.bf16 %v185_v26, %v184_v25  ;;  %v186_v31 = vld [vmem:[#allocation7 + $0x40] sm:$0xff]  ;;  %v187_v32 = vld [vmem:[#allocation7 + $0x48] sm:$0xff] }
  0x52   :  { %564 = vmatpush3.bf16.msra.mxu0 %v563_v7  ;;  %v575_v33 = vpack.c.bf16 %v95_v29, %v94_v28  ;;  %v96_v34 = vld [vmem:[#allocation5 + $0x60] sm:$0xff]  ;;  %v97_v35 = vld [vmem:[#allocation5 + $0x68] sm:$0xff]  ;;  %v596_v36 = vpack.c.bf16 %v187_v32, %v186_v31  ;;  %v188_v37 = vld [vmem:[#allocation7 + $0x50] sm:$0xff] }
  0x53   :  { %565 = vmatprep.subr.bf16.mxu0 %v792_v0  ;;  %v189_v38 = vld [vmem:[#allocation7 + $0x58] sm:$0xff]  ;;  %v578_v39 = vpack.c.bf16 %v97_v35, %v96_v34  ;;  %v98_v40 = vld [vmem:[#allocation5 + $0x70] sm:$0xff]  ;;  %v190_v43 = vld [vmem:[#allocation7 + $0x60] sm:$0xff] }
  0x54   :  { %588 = vmatpush3.bf16.msra.mxu1 %v587_v18  ;;  %v99_v41 = vld [vmem:[#allocation5 + $0x78] sm:$0xff]  ;;  %v599_v42 = vpack.c.bf16 %v189_v38, %v188_v37  ;;  %v191_v44 = vld [vmem:[#allocation7 + $0x68] sm:$0xff]  ;;  %v192_v48 = vld [vmem:[#allocation7 + $0x70] sm:$0xff] }
  0x55   :  { %589 = vmatprep.subr.bf16.mxu1 %v792_v0  ;;  %v581_v45 = vpack.c.bf16 %v99_v41, %v98_v40  ;;  %v602_v46 = vpack.c.bf16 %v191_v44, %v190_v43  ;;  %v83_v47 = vld [vmem:[#allocation2] sm:$0xff]  ;;  %v273_v51 = vld [vmem:[#allocation8] sm:$0xff]  ;;  %v274_v52 = vld [vmem:[#allocation8 + $0x8] sm:$0xff] }
  0x56   :  { %567 = vmatpush3.bf16.msra.mxu0 %v566_v14  ;;  %v193_v49 = vld [vmem:[#allocation7 + $0x78] sm:$0xff]  ;;  %v275_v53 = vld [vmem:[#allocation8 + $0x10] sm:$0xff]  ;;  %v608_v54 = vpack.c.bf16 %v274_v52, %v273_v51  ;;  %v277_v57 = vld [vmem:[#allocation8 + $0x20] sm:$0xff] }
  0x57   :  { %568 = vmatprep.subr.bf16.mxu0 %v792_v0  ;;  %v605_v50 = vpack.c.bf16 %v193_v49, %v192_v48  ;;  %v276_v55 = vld [vmem:[#allocation8 + $0x18] sm:$0xff]  ;;  %v278_v58 = vld [vmem:[#allocation8 + $0x28] sm:$0xff]  ;;  %v279_v60 = vld [vmem:[#allocation8 + $0x30] sm:$0xff] }
  0x58   :  { %591 = vmatpush3.bf16.msra.mxu1 %v590_v24  ;;  %v611_v56 = vpack.c.bf16 %v276_v55, %v275_v53  ;;  %v614_v59 = vpack.c.bf16 %v278_v58, %v277_v57  ;;  %v280_v61 = vld [vmem:[#allocation8 + $0x38] sm:$0xff]  ;;  %v281_v63 = vld [vmem:[#allocation8 + $0x40] sm:$0xff]  ;;  %v283_v3 = vld [vmem:[#allocation8 + $0x50] sm:$0xff] }
  0x59   :  { %592 = vmatprep.subr.bf16.mxu1 %v792_v0  ;;  %v617_v62 = vpack.c.bf16 %v280_v61, %v279_v60  ;;  %v284_v4 = vld [vmem:[#allocation8 + $0x58] sm:$0xff]  ;;  %v285_v6 = vld [vmem:[#allocation8 + $0x60] sm:$0xff]  ;;  %v286_v7 = vld [vmem:[#allocation8 + $0x68] sm:$0xff] }
  0x5a   :  { %570 = vmatpush3.bf16.msra.mxu0 %v569_v21  ;;  %v623_v5 = vpack.c.bf16 %v284_v4, %v283_v3  ;;  %v626_v8 = vpack.c.bf16 %v286_v7, %v285_v6  ;;  %v400_v9 = vld [vmem:[%s964_s2] ss:$0 sm:$0xff]  ;;  %v287_v14 = vld [vmem:[#allocation8 + $0x70] sm:$0xff]  ;;  %s795_s2 = smov [#allocation11]  }
  0x5b   :  { %571 = vmatprep.subr.bf16.mxu0 %v792_v0  ;;  %v288_v15 = vld [vmem:[#allocation8 + $0x78] sm:$0xff]  ;;  %s385_s10 = sshll.u32 %s795_s2, 4  ;;  %s386_s10 = int_to_ptr.vmem [resolvable:$true] %s385_s10 }
  0x5c   :  { %594 = vmatpush3.bf16.msra.mxu1 %v593_v30  ;;  %v629_v16 = vpack.c.bf16 %v288_v15, %v287_v14  ;;  %v401_v17 = vld [vmem:[%s966_s4] ss:$0 sm:$0xff]  ;;  %s732_s11 = scalar_lea.vmem %s386_s10, 128  ;;  %p737_p5 = scmp.lt.s32.totalorder %s386_s10, %s386_s10 }
  0x5d   :  { %595 = vmatprep.subr.bf16.mxu1 %v792_v0  ;;  %p733_p4 = scmp.ne.s32.totalorder %s386_s10, %s732_s11  ;;  %p738_p6 = scmp.lt.s32.totalorder %s732_s11, %s732_s11 }
  0x5e   :  { %573 = vmatpush3.bf16.msra.mxu0 %v572_v27 }
  0x5f   :  { %574 = vmatprep.subr.bf16.mxu0 %v792_v0  ;;  %p739_p7 = por %p738_p6, %p737_p5 }
  0x60   :  { %597 = vmatpush3.bf16.msra.mxu1 %v596_v36 }
  0x61   :  { %598 = vmatprep.subr.bf16.mxu1 %v792_v0  ;;  %p740_p8 = pnand %p739_p7, %p733_p4 }
  0x62   :  { %576 = vmatpush3.bf16.msra.mxu0 %v575_v33 }
  0x63   :  { %577 = vmatprep.subr.bf16.mxu0 %v792_v0 }
  0x64   :  { %600 = vmatpush3.bf16.msra.mxu1 %v599_v42 }
  0x65   :  { %601 = vmatprep.subr.bf16.mxu1 %v792_v0 }
  0x66   :  { %579 = vmatpush3.bf16.msra.mxu0 %v578_v39 }
  0x67   :  { %580 = vmatprep.subr.bf16.mxu0 %v792_v0 }
  0x68   :  { %603 = vmatpush3.bf16.msra.mxu1 %v602_v46 }
  0x69   :  { %604 = vmatprep.subr.bf16.mxu1 %v792_v0 }
  0x6a   :  { %582 = vmatpush3.bf16.msra.mxu0 %v581_v45 }
  0x6b   :  { %607 = vmatprep.subr.bf16.mxu0 %v792_v0 }
  0x6c   :  { %606 = vmatpush3.bf16.msra.mxu1 %v605_v50 }
  0x6d   :  { %487 = vmatmul.mubr.f32.vlgmr.msra.gmra.mrb[0].mxu0 %v83_v47 }
  0x6e   :  { %556 = vmatprep.mubr.msk.f32.mxu0 %vm793_vm0, %v794_v1  ;;  %609 = vmatpush3.bf16.msra.mxu0 %v608_v54  ;;  %v282_v1 = vld [vmem:[#allocation8 + $0x48] sm:$0xff] }
  0x6f   :  { %610 = vmatprep.subr.bf16.mxu0 %v792_v0  ;;  %v620_v2 = vpack.c.bf16 %v282_v1, %v281_v63 }
  0x72   :  { %612 = vmatpush3.bf16.msra.mxu0 %v611_v56 }
  0x73   :  { %613 = vmatprep.subr.bf16.mxu0 %v792_v0 }
  0x76   :  { %615 = vmatpush3.bf16.msra.mxu0 %v614_v59 }
  0x77   :  { %616 = vmatprep.subr.bf16.mxu0 %v792_v0 }
  0x7a   :  { %618 = vmatpush3.bf16.msra.mxu0 %v617_v62 }
  0x7b   :  { %619 = vmatprep.subr.bf16.mxu0 %v792_v0 }
  0x7e   :  { %621 = vmatpush3.bf16.msra.mxu0 %v620_v2 }
  0x7f   :  { %622 = vmatprep.subr.bf16.mxu0 %v792_v0 }
  0x82   :  { %624 = vmatpush3.bf16.msra.mxu0 %v623_v5 }
  0x83   :  { %625 = vmatprep.subr.bf16.mxu0 %v792_v0 }
  0x86   :  { %627 = vmatpush3.bf16.msra.mxu0 %v626_v8 }
  0x87   :  { %628 = vmatprep.subr.bf16.mxu0 %v792_v0 }
  0x8a   :  { %630 = vmatpush3.bf16.msra.mxu0 %v629_v16 }
 0x140   :  { %v173_v10 = vpop.f32.mrb[0].mxu0 }
 0x141   :  { %v174_v11 = vadd.f32 %v400_v9, %v173_v10  ;;  %v488_v12 = vpop.f32.mrb[1].mxu0 }
 0x143   :  { %v177_v13 = vmax.f32 %v174_v11, 0.0 }
 0x145   :  { %522 = vmatmul.mubr.f32.vlgmr.msra.gmra.mrb[0].mxu1 %v177_v13 }
 0x218   :  { %v267_v18 = vpop.f32.mrb[0].mxu1 }
 0x219   :  { %v268_v19 = vadd.f32 %v401_v17, %v267_v18  ;;  %v523_v0 = vpop.f32.mrb[1].mxu1 }
 0x21b   :  { %v271_v20 = vmax.f32 %v268_v19, 0.0 }
 0x21d   :  { %272 = vst [vmem:[#allocation11] sm:$0xff] %v271_v20  ;;  %557 = vmatmul.mubr.f32.vlgmr.msra.gmra.mrb[2].mxu0 %v271_v20 }
 0x21e   :  { %743 = shalt.err (!%p740_p8)
}
 0x21f   :  { %s744_s4 = scalar_lea.hbm %s970_s8, 128 }
 0x220   :  { %p745_p9 = scmp.ne.s32.totalorder %s970_s8, %s744_s4  ;;  %p748_p10 = scmp.lt.u32.totalorder %s744_s4, %s970_s8 }
 0x222   :  { %p750_p11 = pnand %p748_p10, %p745_p9 }
 0x224   :  { %753 = shalt.err (!%p750_p11)
}
 0x225   :  { %388 = dma.vmem_to_hbm [thread:$0]  %s386_s10, 128, %s970_s8, [#allocation12]   ;;  %v402_v21 = vld [vmem:[%s968_s6] ss:$0 sm:$0xff] }
 0x226   :  { %s796_s24 = smov [#allocation10]  }
 0x227   :  { %s375_s25 = sshll.u32 %s796_s24, 4  ;;  %s376_s25 = int_to_ptr.vmem [resolvable:$true] %s375_s25 }
 0x228   :  { %s754_s26 = scalar_lea.vmem %s376_s25, 128  ;;  %p759_p13 = scmp.lt.s32.totalorder %s376_s25, %s376_s25 }
 0x229   :  { %p755_p12 = scmp.ne.s32.totalorder %s376_s25, %s754_s26  ;;  %p760_p0 = scmp.lt.s32.totalorder %s754_s26, %s754_s26 }
 0x22b   :  { %p761_p1 = por %p760_p0, %p759_p13 }
 0x22d   :  { %p762_p2 = pnand %p761_p1, %p755_p12 }
 0x2f0   :  { %v362_v22 = vpop.f32.mrb[2].mxu0 }
 0x2f1   :  { %v363_v23 = vadd.f32 %v402_v21, %v362_v22  ;;  %v558_v24 = vpop.f32.mrb[3].mxu0 }
 0x2f3   :  { %642 = vtanh.f32 %v363_v23 }
 0x2fd   :  { %v643_v25 = vpop.eup %642 }
 0x2fe   :  { %v367_v26 = vmul.f32 2.0, %v643_v25 }
 0x300   :  { %368 = vst [vmem:[#allocation10] sm:$0xff] %v367_v26 }
 0x301   :  { %765 = shalt.err (!%p762_p2)
}
 0x302   :  { %s766_s6 = scalar_lea.hbm %s969_s7, 128 }
 0x303   :  { %p767_p3 = scmp.ne.s32.totalorder %s969_s7, %s766_s6  ;;  %p770_p4 = scmp.lt.u32.totalorder %s766_s6, %s969_s7 }
 0x305   :  { %p772_p5 = pnand %p770_p4, %p767_p3 }
 0x307   :  { %775 = shalt.err (!%p772_p5)
}
 0x308   :  { %378 = dma.vmem_to_hbm [thread:$0]  %s376_s25, 128, %s969_s7, [#allocation4]  }
 0x309   :  { %782 = dma.done.wait [#allocation4], 128  }
 0x30a   :  { %783 = vsyncadd [#allocation4], 4294967168 }
 0x30b   :  { %784 = dma.done.wait [#allocation12], 128  }
 0x30c   :  { %785 = vsyncadd [#allocation12], 4294967168 }
 0x30d   :  { %395 = vsyncpa [#allocation3], 1 }
 0x30e   :  { %396 = vsyncpa [#allocation6], 1 }
 0x30f   :  { %397 = vsyncpa [#allocation9], 1 }
 0x310   :  { %398 = vsyncpa [#allocation4], 1 }
 0x311   :  { %399 = vsyncpa [#allocation12], 1 }

</bundles_post_ra>
